<compile_context>
chip_gen: v7x
topology: tpu7x:2x2x1
jax: 0.10.0
libtpu: 0.0.40
codegen_flags: <defaults>
</compile_context>

<pallas_src>
import math
import functools

import jax
import jax.numpy as jnp
from jax import lax
from jax.experimental import pallas as pl
from jax.experimental.pallas import tpu as pltpu


# ---------------------------------------------------------------------------
# Tile helpers: respect the (8, 128) BlockSpec constraint
#   - last block dim must be a multiple of 128 or equal the full array dim
#   - second-to-last block dim must be a multiple of 8 or equal the full dim
# ---------------------------------------------------------------------------
def _tile_minor(dim, preferred):
    t = min(preferred, dim)
    t = (t // 128) * 128
    if t >= 128 and dim % t == 0:
        return t
    for c in (512, 256, 128):
        if c <= dim and dim % c == 0:
            return c
    return dim  # fall back to full dim


def _tile_major(dim, preferred):
    t = min(preferred, dim)
    t = (t // 8) * 8
    if t >= 8 and dim % t == 0:
        return t
    for c in (512, 256, 128, 64, 32, 16, 8):
        if c <= dim and dim % c == 0:
            return c
    return dim  # fall back to full dim


# ---------------------------------------------------------------------------
# Kernel 1: fused bias-free QKV projection (bf16 MXU operands, fp32 acc).
#   q = (x @ wq) * scale, k = x @ wk, v = x @ wv     (x tile read once)
# ---------------------------------------------------------------------------
def _qkv_proj_kernel(x_ref, wq_ref, wk_ref, wv_ref, q_ref, k_ref, v_ref,
                     acc_q, acc_k, acc_v, *, scale):
    @pl.when(pl.program_id(2) == 0)
    def _():
        acc_q[...] = jnp.zeros_like(acc_q)
        acc_k[...] = jnp.zeros_like(acc_k)
        acc_v[...] = jnp.zeros_like(acc_v)

    x = x_ref[...]                                     # bf16 tile
    acc_q[...] += jnp.dot(x, wq_ref[...], preferred_element_type=jnp.float32)
    acc_k[...] += jnp.dot(x, wk_ref[...], preferred_element_type=jnp.float32)
    acc_v[...] += jnp.dot(x, wv_ref[...], preferred_element_type=jnp.float32)

    @pl.when(pl.program_id(2) == pl.num_programs(2) - 1)
    def _():
        # Softmax scale folded into q here, once, instead of per-KV-step.
        q_ref[...] = (acc_q[...] * scale).astype(q_ref.dtype)
        k_ref[...] = acc_k[...].astype(k_ref.dtype)
        v_ref[...] = acc_v[...].astype(v_ref.dtype)


def pallas_qkv_proj(x, wq, wk, wv, *, scale, out_dtype=jnp.bfloat16,
                    tm=512, tn=512, tk=256):
    """x: (M, K) bf16; wq/wk/wv: (K, N) bf16 -> (q, k, v), each (M, N) bf16."""
    M, K = x.shape
    K2, N = wq.shape
    assert K == K2
    tm = _tile_major(M, tm)
    tn = _tile_minor(N, tn)
    tk = _tile_minor(K, tk)
    grid = (M // tm, N // tn, K // tk)

    x_spec = pl.BlockSpec((tm, tk), lambda i, j, k: (i, k))
    w_spec = pl.BlockSpec((tk, tn), lambda i, j, k: (k, j))
    o_spec = pl.BlockSpec((tm, tn), lambda i, j, k: (i, j))
    o_shape = jax.ShapeDtypeStruct((M, N), out_dtype)

    return pl.pallas_call(
        functools.partial(_qkv_proj_kernel, scale=scale),
        out_shape=(o_shape, o_shape, o_shape),
        grid=grid,
        in_specs=[x_spec, w_spec, w_spec, w_spec],
        out_specs=(o_spec, o_spec, o_spec),
        scratch_shapes=[pltpu.VMEM((tm, tn), jnp.float32)] * 3,
        compiler_params=pltpu.CompilerParams(
            dimension_semantics=("parallel", "parallel", "arbitrary")),
    )(x, wq, wk, wv)


# ---------------------------------------------------------------------------
# Kernel 2: tiled linear with bias   out = x @ w + b   (bf16 MXU, fp32 acc)
# ---------------------------------------------------------------------------
def _linear_bias_kernel(x_ref, w_ref, b_ref, o_ref, acc_ref):
    @pl.when(pl.program_id(2) == 0)
    def _():
        acc_ref[...] = jnp.zeros_like(acc_ref)

    acc_ref[...] += jnp.dot(x_ref[...], w_ref[...],
                            preferred_element_type=jnp.float32)

    @pl.when(pl.program_id(2) == pl.num_programs(2) - 1)
    def _():
        o_ref[...] = (acc_ref[...] + b_ref[...]).astype(o_ref.dtype)


def pallas_linear_bias(x, w, b, *, out_dtype=None, tm=512, tn=512, tk=256):
    """x: (M, K), w: (K, N), b: (N,) -> (M, N)."""
    M, K = x.shape
    K2, N = w.shape
    assert K == K2
    if out_dtype is None:
        out_dtype = x.dtype
    tm = _tile_major(M, tm)
    tn = _tile_minor(N, tn)
    tk = _tile_minor(K, tk)
    grid = (M // tm, N // tn, K // tk)

    return pl.pallas_call(
        _linear_bias_kernel,
        out_shape=jax.ShapeDtypeStruct((M, N), out_dtype),
        grid=grid,
        in_specs=[
            pl.BlockSpec((tm, tk), lambda i, j, k: (i, k)),
            pl.BlockSpec((tk, tn), lambda i, j, k: (k, j)),
            pl.BlockSpec((1, tn), lambda i, j, k: (0, j)),
        ],
        out_specs=pl.BlockSpec((tm, tn), lambda i, j, k: (i, j)),
        scratch_shapes=[pltpu.VMEM((tm, tn), jnp.float32)],
        compiler_params=pltpu.CompilerParams(
            dimension_semantics=("parallel", "parallel", "arbitrary")),
    )(x, w, b.astype(jnp.float32).reshape(1, N))


# ---------------------------------------------------------------------------
# Kernel 3: flash attention, heads on the grid, KV-tiled online softmax.
#   q, k, v, out are (B, H, L, Dh); every block covers its full last dim.
#   Softmax scale is already folded into q.
# ---------------------------------------------------------------------------
def _flash_attn_kernel(q_ref, k_ref, v_ref, o_ref, m_ref, l_ref, acc_ref):
    kv = pl.program_id(3)

    @pl.when(kv == 0)
    def _():
        m_ref[...] = jnp.full_like(m_ref, -jnp.inf)
        l_ref[...] = jnp.zeros_like(l_ref)
        acc_ref[...] = jnp.zeros_like(acc_ref)

    q = q_ref[...]                                   # (TQ, Dh) bf16, pre-scaled
    k = k_ref[...]                                   # (TKV, Dh) bf16
    v = v_ref[...]                                   # (TKV, Dh) bf16

    # scores = q @ k^T : contract last dims, no materialized transpose
    s = lax.dot_general(q, k,
                        dimension_numbers=(((1,), (1,)), ((), ())),
                        preferred_element_type=jnp.float32)      # (TQ, TKV) f32

    m_prev = m_ref[...]                              # (TQ, 1)
    m_new = jnp.maximum(m_prev, jnp.max(s, axis=-1, keepdims=True))
    alpha = jnp.exp(m_prev - m_new)                  # rescale of old accumulator
    p = jnp.exp(s - m_new)                           # (TQ, TKV) f32

    l_ref[...] = alpha * l_ref[...] + jnp.sum(p, axis=-1, keepdims=True)
    acc_ref[...] = alpha * acc_ref[...] + jnp.dot(
        p.astype(v.dtype), v, preferred_element_type=jnp.float32)
    m_ref[...] = m_new

    @pl.when(kv == pl.num_programs(3) - 1)
    def _():
        # Single full-width store; exact divide runs once per q tile.
        o_ref[...] = (acc_ref[...] / l_ref[...]).astype(o_ref.dtype)


def pallas_flash_attention(q, k, v, *, tq=256, tkv=256):
    """q, k, v: (B, H, L, Dh) -> (B, H, L, Dh)."""
    B, H, L, Dh = q.shape
    tq = _tile_major(L, tq)
    tkv = _tile_major(L, tkv)
    grid = (B, H, L // tq, L // tkv)

    q_spec = pl.BlockSpec((None, None, tq, Dh), lambda b, h, qi, ki: (b, h, qi, 0))
    kv_spec = pl.BlockSpec((None, None, tkv, Dh), lambda b, h, qi, ki: (b, h, ki, 0))
    # NOTE: if profiling shows exposed K/V DMA at small tkv, add
    # pipeline_mode=pl.Buffered(3) to kv_spec (watch VMEM on v7x).
    o_spec = pl.BlockSpec((None, None, tq, Dh), lambda b, h, qi, ki: (b, h, qi, 0))

    return pl.pallas_call(
        _flash_attn_kernel,
        out_shape=jax.ShapeDtypeStruct((B, H, L, Dh), q.dtype),
        grid=grid,
        in_specs=[q_spec, kv_spec, kv_spec],
        out_specs=o_spec,
        scratch_shapes=[
            pltpu.VMEM((tq, 1), jnp.float32),        # running max
            pltpu.VMEM((tq, 1), jnp.float32),        # running denominator
            pltpu.VMEM((tq, Dh), jnp.float32),       # output accumulator
        ],
        compiler_params=pltpu.CompilerParams(
            dimension_semantics=("parallel", "parallel", "parallel", "arbitrary")),
    )(q, k, v)


# ---------------------------------------------------------------------------
# Module-equivalent forward
# ---------------------------------------------------------------------------
def flash_attention_forward(x, params, num_heads):
    """x: (B, L, D).  params: w_qkv (3D, D), w_o (D, D), b_o (D,)  [PyTorch layout]."""
    B, L, D = x.shape
    Dh = D // num_heads
    scale = 1.0 / math.sqrt(Dh)

    # nn.Linear stores weights as (out_features, in_features); split the QKV
    # weight into per-projection (K, N) bf16 matrices (weight-only, negligible).
    w_qkv = params["w_qkv"]                      # (3D, D)
    w_q = w_qkv[:D].T.astype(jnp.bfloat16)       # (D, D)
    w_k = w_qkv[D:2 * D].T.astype(jnp.bfloat16)
    w_v = w_qkv[2 * D:].T.astype(jnp.bfloat16)
    w_o = params["w_o"].T.astype(jnp.bfloat16)

    x2 = x.reshape(B * L, D).astype(jnp.bfloat16)
    q2, k2, v2 = pallas_qkv_proj(x2, w_q, w_k, w_v, scale=scale)   # bf16 (B*L, D)

    # Layout plumbing: folded (B*L, H*Dh) -> per-head (B, H, L, Dh), so the
    # attention grid iterates heads and each block keeps its full last dim
    # (no masked lane slices, no per-head unroll).
    def split_heads(t):
        return t.reshape(B, L, num_heads, Dh).transpose(0, 2, 1, 3)

    q = split_heads(q2)
    k = split_heads(k2)
    v = split_heads(v2)

    # TODO(synk): attention-probability dropout (training mode) not implemented.
    attn = pallas_flash_attention(q, k, v)                         # (B, H, L, Dh)
    attn = attn.transpose(0, 2, 1, 3).reshape(B * L, D)            # back to folded

    y = pallas_linear_bias(attn, w_o, params["b_o"], out_dtype=x.dtype)
    return y.reshape(B, L, D)


# ---------------------------------------------------------------------------
# Pure-JAX reference (fp32) for correctness checking
# ---------------------------------------------------------------------------
def reference_forward(x, params, num_heads):
    B, L, D = x.shape
    Dh = D // num_heads
    scale = 1.0 / math.sqrt(Dh)
    qkv = x @ params["w_qkv"].T
    qkv = qkv.reshape(B, L, 3, num_heads, Dh).transpose(2, 0, 3, 1, 4)
    q, k, v = qkv[0], qkv[1], qkv[2]
    s = jnp.einsum("bhqd,bhkd->bhqk", q, k) * scale
    a = jax.nn.softmax(s, axis=-1)
    o = jnp.einsum("bhqk,bhkd->bhqd", a, v)
    o = o.transpose(0, 2, 1, 3).reshape(B, L, D)
    return o @ params["w_o"].T + params["b_o"]


if __name__ == "__main__":
    B, L, d_model, num_heads = 2, 8, 32, 4

    key = jax.random.PRNGKey(0)
    k_x, k_qkv, k_o, k_bo = jax.random.split(key, 4)

    bound = 1.0 / math.sqrt(d_model)
    params = {
        "w_qkv": jax.random.uniform(k_qkv, (3 * d_model, d_model),
                                    jnp.float32, -bound, bound),
        "w_o": jax.random.uniform(k_o, (d_model, d_model),
                                  jnp.float32, -bound, bound),
        "b_o": jax.random.uniform(k_bo, (d_model,),
                                  jnp.float32, -bound, bound),
    }

    x = jax.random.normal(k_x, (B, L, d_model), jnp.float32)

    fwd = jax.jit(functools.partial(flash_attention_forward, num_heads=num_heads))
    out = jax.block_until_ready(fwd(x, params))

    ref = reference_forward(x, params, num_heads)
    assert out.shape == (B, L, d_model)
    # Tolerance accounts for bf16 MXU operands (fp32 reference).
    assert jnp.allclose(out, ref, atol=3e-2, rtol=3e-2), "mismatch vs reference"

    print("KERNEL_OK")
</pallas_src>

<mosaic_0001>
module attributes {stable_mosaic.version = 11 : i64} {
  func.func @_qkv_proj_kernel(%arg0: i32, %arg1: i32, %arg2: i32, %arg3: memref<16x32xbf16, #tpu.memory_space<vmem>>, %arg4: memref<32x32xbf16, #tpu.memory_space<vmem>>, %arg5: memref<32x32xbf16, #tpu.memory_space<vmem>>, %arg6: memref<32x32xbf16, #tpu.memory_space<vmem>>, %arg7: memref<16x32xbf16, #tpu.memory_space<vmem>>, %arg8: memref<16x32xbf16, #tpu.memory_space<vmem>>, %arg9: memref<16x32xbf16, #tpu.memory_space<vmem>>, %arg10: memref<16x32xf32, #tpu.memory_space<vmem>>, %arg11: memref<16x32xf32, #tpu.memory_space<vmem>>, %arg12: memref<16x32xf32, #tpu.memory_space<vmem>>) attributes {dimension_semantics = [#tpu.dimension_semantics<parallel>, #tpu.dimension_semantics<parallel>, #tpu.dimension_semantics<arbitrary>], iteration_bounds = array<i64: 1, 1, 1>, scalar_prefetch = 0 : i64, scratch_operands = 3 : i64, tpu.core_type = #tpu.core_type<tc>, window_params = [{transform_indices = @transform_0, window_bounds = array<i64: 16, 32>}, {transform_indices = @transform_1, window_bounds = array<i64: 32, 32>}, {transform_indices = @transform_2, window_bounds = array<i64: 32, 32>}, {transform_indices = @transform_3, window_bounds = array<i64: 32, 32>}, {transform_indices = @transform_4, window_bounds = array<i64: 16, 32>}, {transform_indices = @transform_5, window_bounds = array<i64: 16, 32>}, {transform_indices = @transform_6, window_bounds = array<i64: 16, 32>}]} {
    %c0_i32 = arith.constant 0 : i32
    %0 = arith.cmpi eq, %arg2, %c0_i32 : i32
    %1 = arith.extui %0 : i1 to i32
    %c0_i32_0 = arith.constant 0 : i32
    %2 = arith.cmpi ne, %1, %c0_i32_0 : i32
    scf.if %2 {
      %cst_24 = arith.constant 0.000000e+00 : f32
      %22 = vector.broadcast %cst_24 : f32 to vector<16x32xf32>
      %c0_25 = arith.constant 0 : index
      %c0_26 = arith.constant 0 : index
      %23 = vector.load %arg10[%c0_25, %c0_26] : memref<16x32xf32, #tpu.memory_space<vmem>>, vector<16x32xf32>
      tpu.vector_store %arg10[%c0_25, %c0_26], %22 {strides = array<i32>} : memref<16x32xf32, #tpu.memory_space<vmem>>, vector<16x32xf32>,
      %cst_27 = arith.constant 0.000000e+00 : f32
      %24 = vector.broadcast %cst_27 : f32 to vector<16x32xf32>
      %c0_28 = arith.constant 0 : index
      %c0_29 = arith.constant 0 : index
      %25 = vector.load %arg11[%c0_28, %c0_29] : memref<16x32xf32, #tpu.memory_space<vmem>>, vector<16x32xf32>
      tpu.vector_store %arg11[%c0_28, %c0_29], %24 {strides = array<i32>} : memref<16x32xf32, #tpu.memory_space<vmem>>, vector<16x32xf32>,
      %cst_30 = arith.constant 0.000000e+00 : f32
      %26 = vector.broadcast %cst_30 : f32 to vector<16x32xf32>
      %c0_31 = arith.constant 0 : index
      %c0_32 = arith.constant 0 : index
      %27 = vector.load %arg12[%c0_31, %c0_32] : memref<16x32xf32, #tpu.memory_space<vmem>>, vector<16x32xf32>
      tpu.vector_store %arg12[%c0_31, %c0_32], %26 {strides = array<i32>} : memref<16x32xf32, #tpu.memory_space<vmem>>, vector<16x32xf32>,
    } else {
    }
    %c0 = arith.constant 0 : index
    %c0_1 = arith.constant 0 : index
    %3 = vector.load %arg3[%c0, %c0_1] : memref<16x32xbf16, #tpu.memory_space<vmem>>, vector<16x32xbf16>
    %c0_2 = arith.constant 0 : index
    %c0_3 = arith.constant 0 : index
    %4 = vector.load %arg10[%c0_2, %c0_3] : memref<16x32xf32, #tpu.memory_space<vmem>>, vector<16x32xf32>
    %c0_4 = arith.constant 0 : index
    %c0_5 = arith.constant 0 : index
    %5 = vector.load %arg4[%c0_4, %c0_5] : memref<32x32xbf16, #tpu.memory_space<vmem>>, vector<32x32xbf16>
    %cst = arith.constant dense<0.000000e+00> : vector<16x32xf32>
    %6 = tpu.matmul %3, %5, %cst {dimension_numbers = #tpu.dot_dimension_numbers<[1], [0], [0], [1], [0, 0, 1, 1], [], []>} : vector<16x32xbf16>, vector<32x32xbf16>, vector<16x32xf32> -> vector<16x32xf32>
    %7 = arith.addf %4, %6 : vector<16x32xf32>
    %c0_6 = arith.constant 0 : index
    %c0_7 = arith.constant 0 : index
    %8 = vector.load %arg10[%c0_6, %c0_7] : memref<16x32xf32, #tpu.memory_space<vmem>>, vector<16x32xf32>
    tpu.vector_store %arg10[%c0_6, %c0_7], %7 {strides = array<i32>} : memref<16x32xf32, #tpu.memory_space<vmem>>, vector<16x32xf32>,
    %c0_8 = arith.constant 0 : index
    %c0_9 = arith.constant 0 : index
    %9 = vector.load %arg11[%c0_8, %c0_9] : memref<16x32xf32, #tpu.memory_space<vmem>>, vector<16x32xf32>
    %c0_10 = arith.constant 0 : index
    %c0_11 = arith.constant 0 : index
    %10 = vector.load %arg5[%c0_10, %c0_11] : memref<32x32xbf16, #tpu.memory_space<vmem>>, vector<32x32xbf16>
    %cst_12 = arith.constant dense<0.000000e+00> : vector<16x32xf32>
    %11 = tpu.matmul %3, %10, %cst_12 {dimension_numbers = #tpu.dot_dimension_numbers<[1], [0], [0], [1], [0, 0, 1, 1], [], []>} : vector<16x32xbf16>, vector<32x32xbf16>, vector<16x32xf32> -> vector<16x32xf32>
    %12 = arith.addf %9, %11 : vector<16x32xf32>
    %c0_13 = arith.constant 0 : index
    %c0_14 = arith.constant 0 : index
    %13 = vector.load %arg11[%c0_13, %c0_14] : memref<16x32xf32, #tpu.memory_space<vmem>>, vector<16x32xf32>
    tpu.vector_store %arg11[%c0_13, %c0_14], %12 {strides = array<i32>} : memref<16x32xf32, #tpu.memory_space<vmem>>, vector<16x32xf32>,
    %c0_15 = arith.constant 0 : index
    %c0_16 = arith.constant 0 : index
    %14 = vector.load %arg12[%c0_15, %c0_16] : memref<16x32xf32, #tpu.memory_space<vmem>>, vector<16x32xf32>
    %c0_17 = arith.constant 0 : index
    %c0_18 = arith.constant 0 : index
    %15 = vector.load %arg6[%c0_17, %c0_18] : memref<32x32xbf16, #tpu.memory_space<vmem>>, vector<32x32xbf16>
    %cst_19 = arith.constant dense<0.000000e+00> : vector<16x32xf32>
    %16 = tpu.matmul %3, %15, %cst_19 {dimension_numbers = #tpu.dot_dimension_numbers<[1], [0], [0], [1], [0, 0, 1, 1], [], []>} : vector<16x32xbf16>, vector<32x32xbf16>, vector<16x32xf32> -> vector<16x32xf32>
    %17 = arith.addf %14, %16 : vector<16x32xf32>
    %c0_20 = arith.constant 0 : index
    %c0_21 = arith.constant 0 : index
    %18 = vector.load %arg12[%c0_20, %c0_21] : memref<16x32xf32, #tpu.memory_space<vmem>>, vector<16x32xf32>
    tpu.vector_store %arg12[%c0_20, %c0_21], %17 {strides = array<i32>} : memref<16x32xf32, #tpu.memory_space<vmem>>, vector<16x32xf32>,
    %c0_i32_22 = arith.constant 0 : i32
    %19 = arith.cmpi eq, %arg2, %c0_i32_22 : i32
    %20 = arith.extui %19 : i1 to i32
    %c0_i32_23 = arith.constant 0 : i32
    %21 = arith.cmpi ne, %20, %c0_i32_23 : i32
    scf.if %21 {
      %c0_24 = arith.constant 0 : index
      %c0_25 = arith.constant 0 : index
      %22 = vector.load %arg10[%c0_24, %c0_25] : memref<16x32xf32, #tpu.memory_space<vmem>>, vector<16x32xf32>
      %cst_26 = arith.constant 0.353553385 : f32
      %23 = vector.broadcast %cst_26 : f32 to vector<16x32xf32>
      %24 = arith.mulf %22, %23 : vector<16x32xf32>
      %25 = arith.truncf %24 : vector<16x32xf32> to vector<16x32xbf16>
      %c0_27 = arith.constant 0 : index
      %c0_28 = arith.constant 0 : index
      %26 = vector.load %arg7[%c0_27, %c0_28] : memref<16x32xbf16, #tpu.memory_space<vmem>>, vector<16x32xbf16>
      tpu.vector_store %arg7[%c0_27, %c0_28], %25 {strides = array<i32>} : memref<16x32xbf16, #tpu.memory_space<vmem>>, vector<16x32xbf16>,
      %c0_29 = arith.constant 0 : index
      %c0_30 = arith.constant 0 : index
      %27 = vector.load %arg11[%c0_29, %c0_30] : memref<16x32xf32, #tpu.memory_space<vmem>>, vector<16x32xf32>
      %28 = arith.truncf %27 : vector<16x32xf32> to vector<16x32xbf16>
      %c0_31 = arith.constant 0 : index
      %c0_32 = arith.constant 0 : index
      %29 = vector.load %arg8[%c0_31, %c0_32] : memref<16x32xbf16, #tpu.memory_space<vmem>>, vector<16x32xbf16>
      tpu.vector_store %arg8[%c0_31, %c0_32], %28 {strides = array<i32>} : memref<16x32xbf16, #tpu.memory_space<vmem>>, vector<16x32xbf16>,
      %c0_33 = arith.constant 0 : index
      %c0_34 = arith.constant 0 : index
      %30 = vector.load %arg12[%c0_33, %c0_34] : memref<16x32xf32, #tpu.memory_space<vmem>>, vector<16x32xf32>
      %31 = arith.truncf %30 : vector<16x32xf32> to vector<16x32xbf16>
      %c0_35 = arith.constant 0 : index
      %c0_36 = arith.constant 0 : index
      %32 = vector.load %arg9[%c0_35, %c0_36] : memref<16x32xbf16, #tpu.memory_space<vmem>>, vector<16x32xbf16>
      tpu.vector_store %arg9[%c0_35, %c0_36], %31 {strides = array<i32>} : memref<16x32xbf16, #tpu.memory_space<vmem>>, vector<16x32xbf16>,
    } else {
    }
    return
  }
  func.func @transform_0(%arg0: i32, %arg1: i32, %arg2: i32) -> (i32, i32) {
    %c0_i32 = arith.constant 0 : i32
    return %arg0, %arg2 : i32, i32
  }
  func.func @transform_1(%arg0: i32, %arg1: i32, %arg2: i32) -> (i32, i32) {
    %c0_i32 = arith.constant 0 : i32
    return %arg2, %arg1 : i32, i32
  }
  func.func @transform_2(%arg0: i32, %arg1: i32, %arg2: i32) -> (i32, i32) {
    %c0_i32 = arith.constant 0 : i32
    return %arg2, %arg1 : i32, i32
  }
  func.func @transform_3(%arg0: i32, %arg1: i32, %arg2: i32) -> (i32, i32) {
    %c0_i32 = arith.constant 0 : i32
    return %arg2, %arg1 : i32, i32
  }
  func.func @transform_4(%arg0: i32, %arg1: i32, %arg2: i32) -> (i32, i32) {
    %c0_i32 = arith.constant 0 : i32
    return %arg0, %arg1 : i32, i32
  }
  func.func @transform_5(%arg0: i32, %arg1: i32, %arg2: i32) -> (i32, i32) {
    %c0_i32 = arith.constant 0 : i32
    return %arg0, %arg1 : i32, i32
  }
  func.func @transform_6(%arg0: i32, %arg1: i32, %arg2: i32) -> (i32, i32) {
    %c0_i32 = arith.constant 0 : i32
    return %arg0, %arg1 : i32, i32
  }
}

module attributes {stable_mosaic.version = 11 : i64} {
  func.func @_linear_bias_kernel(%arg0: i32, %arg1: i32, %arg2: i32, %arg3: memref<16x32xbf16, #tpu.memory_space<vmem>>, %arg4: memref<32x32xbf16, #tpu.memory_space<vmem>>, %arg5: memref<1x32xf32, #tpu.memory_space<vmem>>, %arg6: memref<16x32xf32, #tpu.memory_space<vmem>>, %arg7: memref<16x32xf32, #tpu.memory_space<vmem>>) attributes {dimension_semantics = [#tpu.dimension_semantics<parallel>, #tpu.dimension_semantics<parallel>, #tpu.dimension_semantics<arbitrary>], iteration_bounds = array<i64: 1, 1, 1>, scalar_prefetch = 0 : i64, scratch_operands = 1 : i64, tpu.core_type = #tpu.core_type<tc>, window_params = [{transform_indices = @transform_0, window_bounds = array<i64: 16, 32>}, {transform_indices = @transform_1, window_bounds = array<i64: 32, 32>}, {transform_indices = @transform_2, window_bounds = array<i64: 1, 32>}, {transform_indices = @transform_3, window_bounds = array<i64: 16, 32>}]} {
    %c0_i32 = arith.constant 0 : i32
    %0 = arith.cmpi eq, %arg2, %c0_i32 : i32
    %1 = arith.extui %0 : i1 to i32
    %c0_i32_0 = arith.constant 0 : i32
    %2 = arith.cmpi ne, %1, %c0_i32_0 : i32
    scf.if %2 {
      %cst_10 = arith.constant 0.000000e+00 : f32
      %12 = vector.broadcast %cst_10 : f32 to vector<16x32xf32>
      %c0_11 = arith.constant 0 : index
      %c0_12 = arith.constant 0 : index
      %13 = vector.load %arg7[%c0_11, %c0_12] : memref<16x32xf32, #tpu.memory_space<vmem>>, vector<16x32xf32>
      tpu.vector_store %arg7[%c0_11, %c0_12], %12 {strides = array<i32>} : memref<16x32xf32, #tpu.memory_space<vmem>>, vector<16x32xf32>,
    } else {
    }
    %c0 = arith.constant 0 : index
    %c0_1 = arith.constant 0 : index
    %3 = vector.load %arg7[%c0, %c0_1] : memref<16x32xf32, #tpu.memory_space<vmem>>, vector<16x32xf32>
    %c0_2 = arith.constant 0 : index
    %c0_3 = arith.constant 0 : index
    %4 = vector.load %arg3[%c0_2, %c0_3] : memref<16x32xbf16, #tpu.memory_space<vmem>>, vector<16x32xbf16>
    %c0_4 = arith.constant 0 : index
    %c0_5 = arith.constant 0 : index
    %5 = vector.load %arg4[%c0_4, %c0_5] : memref<32x32xbf16, #tpu.memory_space<vmem>>, vector<32x32xbf16>
    %cst = arith.constant dense<0.000000e+00> : vector<16x32xf32>
    %6 = tpu.matmul %4, %5, %cst {dimension_numbers = #tpu.dot_dimension_numbers<[1], [0], [0], [1], [0, 0, 1, 1], [], []>} : vector<16x32xbf16>, vector<32x32xbf16>, vector<16x32xf32> -> vector<16x32xf32>
    %7 = arith.addf %3, %6 : vector<16x32xf32>
    %c0_6 = arith.constant 0 : index
    %c0_7 = arith.constant 0 : index
    %8 = vector.load %arg7[%c0_6, %c0_7] : memref<16x32xf32, #tpu.memory_space<vmem>>, vector<16x32xf32>
    tpu.vector_store %arg7[%c0_6, %c0_7], %7 {strides = array<i32>} : memref<16x32xf32, #tpu.memory_space<vmem>>, vector<16x32xf32>,
    %c0_i32_8 = arith.constant 0 : i32
    %9 = arith.cmpi eq, %arg2, %c0_i32_8 : i32
    %10 = arith.extui %9 : i1 to i32
    %c0_i32_9 = arith.constant 0 : i32
    %11 = arith.cmpi ne, %10, %c0_i32_9 : i32
    scf.if %11 {
      %c0_10 = arith.constant 0 : index
      %c0_11 = arith.constant 0 : index
      %12 = vector.load %arg7[%c0_10, %c0_11] : memref<16x32xf32, #tpu.memory_space<vmem>>, vector<16x32xf32>
      %c0_12 = arith.constant 0 : index
      %c0_13 = arith.constant 0 : index
      %13 = vector.load %arg5[%c0_12, %c0_13] : memref<1x32xf32, #tpu.memory_space<vmem>>, vector<1x32xf32>
      %14 = vector.broadcast %13 : vector<1x32xf32> to vector<16x32xf32>
      %15 = arith.addf %12, %14 : vector<16x32xf32>
      %c0_14 = arith.constant 0 : index
      %c0_15 = arith.constant 0 : index
      %16 = vector.load %arg6[%c0_14, %c0_15] : memref<16x32xf32, #tpu.memory_space<vmem>>, vector<16x32xf32>
      tpu.vector_store %arg6[%c0_14, %c0_15], %15 {strides = array<i32>} : memref<16x32xf32, #tpu.memory_space<vmem>>, vector<16x32xf32>,
    } else {
    }
    return
  }
  func.func @transform_0(%arg0: i32, %arg1: i32, %arg2: i32) -> (i32, i32) {
    %c0_i32 = arith.constant 0 : i32
    return %arg0, %arg2 : i32, i32
  }
  func.func @transform_1(%arg0: i32, %arg1: i32, %arg2: i32) -> (i32, i32) {
    %c0_i32 = arith.constant 0 : i32
    return %arg2, %arg1 : i32, i32
  }
  func.func @transform_2(%arg0: i32, %arg1: i32, %arg2: i32) -> (i32, i32) {
    %c0_i32 = arith.constant 0 : i32
    %c0_i32_0 = arith.constant 0 : i32
    return %c0_i32, %arg1 : i32, i32
  }
  func.func @transform_3(%arg0: i32, %arg1: i32, %arg2: i32) -> (i32, i32) {
    %c0_i32 = arith.constant 0 : i32
    return %arg0, %arg1 : i32, i32
  }
}

module attributes {stable_mosaic.version = 11 : i64} {
  func.func @_flash_attn_kernel(%arg0: i32, %arg1: i32, %arg2: i32, %arg3: i32, %arg4: memref<1x1x8x8xbf16, #tpu.memory_space<vmem>>, %arg5: memref<1x1x8x8xbf16, #tpu.memory_space<vmem>>, %arg6: memref<1x1x8x8xbf16, #tpu.memory_space<vmem>>, %arg7: memref<1x1x8x8xbf16, #tpu.memory_space<vmem>>, %arg8: memref<8x1xf32, #tpu.memory_space<vmem>>, %arg9: memref<8x1xf32, #tpu.memory_space<vmem>>, %arg10: memref<8x8xf32, #tpu.memory_space<vmem>>) attributes {dimension_semantics = [#tpu.dimension_semantics<parallel>, #tpu.dimension_semantics<parallel>, #tpu.dimension_semantics<parallel>, #tpu.dimension_semantics<arbitrary>], iteration_bounds = array<i64: 2, 4, 1, 1>, scalar_prefetch = 0 : i64, scratch_operands = 3 : i64, tpu.core_type = #tpu.core_type<tc>, window_params = [{transform_indices = @transform_0, window_bounds = array<i64: 1, 1, 8, 8>}, {transform_indices = @transform_1, window_bounds = array<i64: 1, 1, 8, 8>}, {transform_indices = @transform_2, window_bounds = array<i64: 1, 1, 8, 8>}, {transform_indices = @transform_3, window_bounds = array<i64: 1, 1, 8, 8>}]} {
    %c0_i32 = arith.constant 0 : i32
    %0 = arith.cmpi eq, %arg3, %c0_i32 : i32
    %1 = arith.extui %0 : i1 to i32
    %c0_i32_0 = arith.constant 0 : i32
    %2 = arith.cmpi ne, %1, %c0_i32_0 : i32
    scf.if %2 {
      %cst_29 = arith.constant 0xFF800000 : f32
      %36 = vector.broadcast %cst_29 : f32 to vector<8x1xf32>
      %c0_30 = arith.constant 0 : index
      %c0_31 = arith.constant 0 : index
      %37 = vector.load %arg8[%c0_30, %c0_31] : memref<8x1xf32, #tpu.memory_space<vmem>>, vector<8x1xf32>
      tpu.vector_store %arg8[%c0_30, %c0_31], %36 {strides = array<i32>} : memref<8x1xf32, #tpu.memory_space<vmem>>, vector<8x1xf32>,
      %cst_32 = arith.constant 0.000000e+00 : f32
      %38 = vector.broadcast %cst_32 : f32 to vector<8x1xf32>
      %c0_33 = arith.constant 0 : index
      %c0_34 = arith.constant 0 : index
      %39 = vector.load %arg9[%c0_33, %c0_34] : memref<8x1xf32, #tpu.memory_space<vmem>>, vector<8x1xf32>
      tpu.vector_store %arg9[%c0_33, %c0_34], %38 {strides = array<i32>} : memref<8x1xf32, #tpu.memory_space<vmem>>, vector<8x1xf32>,
      %cst_35 = arith.constant 0.000000e+00 : f32
      %40 = vector.broadcast %cst_35 : f32 to vector<8x8xf32>
      %c0_36 = arith.constant 0 : index
      %c0_37 = arith.constant 0 : index
      %41 = vector.load %arg10[%c0_36, %c0_37] : memref<8x8xf32, #tpu.memory_space<vmem>>, vector<8x8xf32>
      tpu.vector_store %arg10[%c0_36, %c0_37], %40 {strides = array<i32>} : memref<8x8xf32, #tpu.memory_space<vmem>>, vector<8x8xf32>,
    } else {
    }
    %c0 = arith.constant 0 : index
    %c0_1 = arith.constant 0 : index
    %c0_2 = arith.constant 0 : index
    %c0_3 = arith.constant 0 : index
    %3 = vector.load %arg4[%c0, %c0_1, %c0_2, %c0_3] : memref<1x1x8x8xbf16, #tpu.memory_space<vmem>>, vector<1x1x8x8xbf16>
    %4 = vector.shape_cast %3 : vector<1x1x8x8xbf16> to vector<8x8xbf16>
    %c0_4 = arith.constant 0 : index
    %c0_5 = arith.constant 0 : index
    %c0_6 = arith.constant 0 : index
    %c0_7 = arith.constant 0 : index
    %5 = vector.load %arg5[%c0_4, %c0_5, %c0_6, %c0_7] : memref<1x1x8x8xbf16, #tpu.memory_space<vmem>>, vector<1x1x8x8xbf16>
    %6 = vector.shape_cast %5 : vector<1x1x8x8xbf16> to vector<8x8xbf16>
    %c0_8 = arith.constant 0 : index
    %c0_9 = arith.constant 0 : index
    %c0_10 = arith.constant 0 : index
    %c0_11 = arith.constant 0 : index
    %7 = vector.load %arg6[%c0_8, %c0_9, %c0_10, %c0_11] : memref<1x1x8x8xbf16, #tpu.memory_space<vmem>>, vector<1x1x8x8xbf16>
    %8 = vector.shape_cast %7 : vector<1x1x8x8xbf16> to vector<8x8xbf16>
    %cst = arith.constant dense<0.000000e+00> : vector<8x8xf32>
    %9 = tpu.matmul %4, %6, %cst {dimension_numbers = #tpu.dot_dimension_numbers<[1], [1], [0], [0], [0, 0, 1, 0], [], []>} : vector<8x8xbf16>, vector<8x8xbf16>, vector<8x8xf32> -> vector<8x8xf32>
    %c0_12 = arith.constant 0 : index
    %c0_13 = arith.constant 0 : index
    %10 = vector.load %arg8[%c0_12, %c0_13] : memref<8x1xf32, #tpu.memory_space<vmem>>, vector<8x1xf32>
    %cst_14 = arith.constant dense<0xFF800000> : vector<8xf32>
    %11 = vector.multi_reduction <maximumf>, %9, %cst_14 [1] : vector<8x8xf32> to vector<8xf32>
    %12 = vector.shape_cast %11 : vector<8xf32> to vector<8x1xf32>
    %13 = arith.maximumf %10, %12 : vector<8x1xf32>
    %14 = arith.subf %10, %13 : vector<8x1xf32>
    %15 = math.exp %14 : vector<8x1xf32>
    %16 = vector.broadcast %13 : vector<8x1xf32> to vector<8x8xf32>
    %17 = arith.subf %9, %16 : vector<8x8xf32>
    %18 = math.exp %17 : vector<8x8xf32>
    %c0_15 = arith.constant 0 : index
    %c0_16 = arith.constant 0 : index
    %19 = vector.load %arg9[%c0_15, %c0_16] : memref<8x1xf32, #tpu.memory_space<vmem>>, vector<8x1xf32>
    %20 = arith.mulf %15, %19 : vector<8x1xf32>
    %cst_17 = arith.constant dense<0.000000e+00> : vector<8xf32>
    %21 = vector.multi_reduction <add>, %18, %cst_17 [1] : vector<8x8xf32> to vector<8xf32>
    %22 = vector.shape_cast %21 : vector<8xf32> to vector<8x1xf32>
    %23 = arith.addf %20, %22 : vector<8x1xf32>
    %c0_18 = arith.constant 0 : index
    %c0_19 = arith.constant 0 : index
    %24 = vector.load %arg9[%c0_18, %c0_19] : memref<8x1xf32, #tpu.memory_space<vmem>>, vector<8x1xf32>
    tpu.vector_store %arg9[%c0_18, %c0_19], %23 {strides = array<i32>} : memref<8x1xf32, #tpu.memory_space<vmem>>, vector<8x1xf32>,
    %c0_20 = arith.constant 0 : index
    %c0_21 = arith.constant 0 : index
    %25 = vector.load %arg10[%c0_20, %c0_21] : memref<8x8xf32, #tpu.memory_space<vmem>>, vector<8x8xf32>
    %26 = vector.broadcast %15 : vector<8x1xf32> to vector<8x8xf32>
    %27 = arith.mulf %26, %25 : vector<8x8xf32>
    %28 = arith.truncf %18 : vector<8x8xf32> to vector<8x8xbf16>
    %cst_22 = arith.constant dense<0.000000e+00> : vector<8x8xf32>
    %29 = tpu.matmul %28, %8, %cst_22 {dimension_numbers = #tpu.dot_dimension_numbers<[1], [0], [0], [1], [0, 0, 1, 1], [], []>} : vector<8x8xbf16>, vector<8x8xbf16>, vector<8x8xf32> -> vector<8x8xf32>
    %30 = arith.addf %27, %29 : vector<8x8xf32>
    %c0_23 = arith.constant 0 : index
    %c0_24 = arith.constant 0 : index
    %31 = vector.load %arg10[%c0_23, %c0_24] : memref<8x8xf32, #tpu.memory_space<vmem>>, vector<8x8xf32>
    tpu.vector_store %arg10[%c0_23, %c0_24], %30 {strides = array<i32>} : memref<8x8xf32, #tpu.memory_space<vmem>>, vector<8x8xf32>,
    %c0_25 = arith.constant 0 : index
    %c0_26 = arith.constant 0 : index
    %32 = vector.load %arg8[%c0_25, %c0_26] : memref<8x1xf32, #tpu.memory_space<vmem>>, vector<8x1xf32>
    tpu.vector_store %arg8[%c0_25, %c0_26], %13 {strides = array<i32>} : memref<8x1xf32, #tpu.memory_space<vmem>>, vector<8x1xf32>,
    %c0_i32_27 = arith.constant 0 : i32
    %33 = arith.cmpi eq, %arg3, %c0_i32_27 : i32
    %34 = arith.extui %33 : i1 to i32
    %c0_i32_28 = arith.constant 0 : i32
    %35 = arith.cmpi ne, %34, %c0_i32_28 : i32
    scf.if %35 {
      %c0_29 = arith.constant 0 : index
      %c0_30 = arith.constant 0 : index
      %36 = vector.load %arg10[%c0_29, %c0_30] : memref<8x8xf32, #tpu.memory_space<vmem>>, vector<8x8xf32>
      %c0_31 = arith.constant 0 : index
      %c0_32 = arith.constant 0 : index
      %37 = vector.load %arg9[%c0_31, %c0_32] : memref<8x1xf32, #tpu.memory_space<vmem>>, vector<8x1xf32>
      %38 = vector.broadcast %37 : vector<8x1xf32> to vector<8x8xf32>
      %39 = arith.divf %36, %38 : vector<8x8xf32>
      %40 = arith.truncf %39 : vector<8x8xf32> to vector<8x8xbf16>
      %c0_33 = arith.constant 0 : index
      %c0_34 = arith.constant 0 : index
      %c0_35 = arith.constant 0 : index
      %c0_36 = arith.constant 0 : index
      %41 = vector.load %arg7[%c0_33, %c0_34, %c0_35, %c0_36] : memref<1x1x8x8xbf16, #tpu.memory_space<vmem>>, vector<1x1x8x8xbf16>
      %42 = vector.shape_cast %41 : vector<1x1x8x8xbf16> to vector<8x8xbf16>
      %43 = vector.shape_cast %40 : vector<8x8xbf16> to vector<1x1x8x8xbf16>
      tpu.vector_store %arg7[%c0_33, %c0_34, %c0_35, %c0_36], %43 {strides = array<i32>} : memref<1x1x8x8xbf16, #tpu.memory_space<vmem>>, vector<1x1x8x8xbf16>,
    } else {
    }
    return
  }
  func.func @transform_0(%arg0: i32, %arg1: i32, %arg2: i32, %arg3: i32) -> (i32, i32, i32, i32) {
    %c0_i32 = arith.constant 0 : i32
    %c0_i32_0 = arith.constant 0 : i32
    return %arg0, %arg1, %arg2, %c0_i32 : i32, i32, i32, i32
  }
  func.func @transform_1(%arg0: i32, %arg1: i32, %arg2: i32, %arg3: i32) -> (i32, i32, i32, i32) {
    %c0_i32 = arith.constant 0 : i32
    %c0_i32_0 = arith.constant 0 : i32
    return %arg0, %arg1, %arg3, %c0_i32 : i32, i32, i32, i32
  }
  func.func @transform_2(%arg0: i32, %arg1: i32, %arg2: i32, %arg3: i32) -> (i32, i32, i32, i32) {
    %c0_i32 = arith.constant 0 : i32
    %c0_i32_0 = arith.constant 0 : i32
    return %arg0, %arg1, %arg3, %c0_i32 : i32, i32, i32, i32
  }
  func.func @transform_3(%arg0: i32, %arg1: i32, %arg2: i32, %arg3: i32) -> (i32, i32, i32, i32) {
    %c0_i32 = arith.constant 0 : i32
    %c0_i32_0 = arith.constant 0 : i32
    return %arg0, %arg1, %arg2, %c0_i32 : i32, i32, i32, i32
  }
}

</mosaic_0001>

<bundles_post_ra>
// kernel: flash_attention_forward.5
= control target key start
LH: loop header
LB: loop body
LE: loop exit
PB: predicated region body
PF: predicated region fallthrough
CT: control target
= control target key end

     0   :  { %v177_v1 = vmov 0.0   ;;  %vm178_vm0 = vmmov 0   ;;  %vm20_vm1 = vcmask 261120   ;;  %s233_s0 = inlined_call_operand.vmem [shape: bf16[16,32], index: 0, kind: input, shape index: {}]   ;;  %s234_s1 = inlined_call_operand.vmem [shape: bf16[32,32], index: 1, kind: input, shape index: {}]   ;;  %s235_s2 = inlined_call_operand.vmem [shape: f32[1,32], index: 2, kind: input, shape index: {}]   ;;  %s236_s3 = inlined_call_operand.hbm [shape: f32[16,32], index: 3, kind: output, shape index: {}]  }
   0x1   :  { %v150_v0 = vld [vmem:[%s234_s1] sm:$0xff]   ;;  %137 = vmatprep.subr.bf16.mxu0 %v177_v1  ;;  %v151_v2 = vld [vmem:[%s234_s1 + $0x8] sm:$0xff]   ;;  %141 = vmatprep.mubr.msk.bf16.mxu0 %vm178_vm0, %v177_v1  ;;  %21 = vst.msk [vmem:[#allocation2] sm:$0xff] %vm20_vm1, %v177_v1  ;;  %22 = vst.msk [vmem:[#allocation2 + $0x8] sm:$0xff] %vm20_vm1, %v177_v1 }
   0x2   :  { %138 = vmatpush3.bf16.msra.mxu0 %v150_v0 }
   0x3   :  { %139 = vmatprep.subr.bf16.mxu0 %v177_v1 }
   0x4   :  { %8 = vsyncpa [#allocation4], 0  ;;  %v152_v3 = vld [vmem:[%s233_s0] sm:$0xff]   ;;  %s179_s0 = smov [#allocation3]  }
   0x5   :  { %v133_v12 = vld [vmem:[%s235_s2] ss:$0 sm:$0xff]  ;;  %s118_s19 = sshll.u32 %s179_s0, 4  ;;  %s119_s19 = int_to_ptr.vmem [resolvable:$true] %s118_s19 }
   0x6   :  { %140 = vmatpush3.bf16.msra.mxu0 %v151_v2  ;;  %s153_s20 = scalar_lea.vmem %s119_s19, 256  ;;  %p158_p1 = scmp.lt.s32.totalorder %s119_s19, %s119_s19 }
   0x7   :  { %p154_p0 = scmp.ne.s32.totalorder %s119_s19, %s153_s20  ;;  %p159_p2 = scmp.lt.s32.totalorder %s153_s20, %s153_s20 }
   0x8   :  { %v23_v4 = vld [vmem:[#allocation2] sm:$0xff]  ;;  %v24_v6 = vld [vmem:[#allocation2 + $0x8] sm:$0xff] }
   0x9   :  { %142 = vmatmul.mubr.msk.bf16.vlgmr.msra.gmra.mrb[0].mxu0 %vm20_vm1, %v152_v3  ;;  %p160_p3 = por %p159_p2, %p158_p1 }
   0xb   :  { %p161_p4 = pnand %p160_p3, %p154_p0 }
  0xdc   :  { %v86_v5 = vpop.f32.mrb[0].mxu0 }
  0xdd   :  { %v93_v7 = vadd.f32 %v86_v5, %v23_v4  ;;  %v143_v8 = vpop.f32.mrb[1].mxu0 }
  0xde   :  { %v89_v9 = vpop.f32.mrb[2].mxu0 }
  0xdf   :  { %95 = vst.msk [vmem:[#allocation2] sm:$0xff] %vm20_vm1, %v93_v7  ;;  %v94_v10 = vadd.f32 %v89_v9, %v24_v6  ;;  %v144_v11 = vpop.f32.mrb[3].mxu0 }
  0xe1   :  { %96 = vst.msk [vmem:[#allocation2 + $0x8] sm:$0xff] %vm20_vm1, %v94_v10 }
  0xe6   :  { %v100_v13 = vld [vmem:[#allocation2] sm:$0xff] }
  0xe7   :  { %v109_v14 = vadd.f32 %v133_v12, %v100_v13 }
  0xe8   :  { %v101_v15 = vld [vmem:[#allocation2 + $0x8] sm:$0xff] }
  0xe9   :  { %v110_v16 = vadd.f32 %v133_v12, %v101_v15  ;;  %111 = vst.msk [vmem:[#allocation3] sm:$0xff] %vm20_vm1, %v109_v14 }
  0xeb   :  { %112 = vst.msk [vmem:[#allocation3 + $0x8] sm:$0xff] %vm20_vm1, %v110_v16 }
  0xec   :  { %164 = shalt.err (!%p161_p4)
}
  0xed   :  { %s165_s22 = scalar_lea.hbm %s236_s3, 256 }
  0xee   :  { %p166_p5 = scmp.ne.s32.totalorder %s236_s3, %s165_s22  ;;  %p169_p6 = scmp.lt.u32.totalorder %s165_s22, %s236_s3 }
  0xf0   :  { %p171_p7 = pnand %p169_p6, %p166_p5 }
  0xf2   :  { %174 = shalt.err (!%p171_p7)
}
  0xf3   :  { %s180_s27 = smov 128   ;;  %s181_s28 = smov 8  }
  0xf4   :  { %124 = dma.vmem_to_hbm [thread:$0]  %s119_s19, 256, %s236_s3, [#allocation4], %s180_s27, %s180_s27, %s181_s28  }
  0xf5   :  { %175 = dma.done.wait [#allocation4], 256  }
  0xf6   :  { %176 = vsyncadd [#allocation4], 4294967040 }
  0xf7   :  { %128 = vsyncpa [#allocation4], 1 }

// kernel: flash_attention_forward.3
= control target key start
LH: loop header
LB: loop body
LE: loop exit
PB: predicated region body
PF: predicated region fallthrough
CT: control target
= control target key end

     0   :  { %vm25_vm0 = vcmask 261120   ;;  %v350_v0 = vmov 0.0   ;;  %vm351_vm1 = vmmov 0   ;;  %vm247_vm2 = vcmask 257024   ;;  %s450_s1 = inlined_call_operand.vmem [shape: bf16[32,32], index: 1, kind: input, shape index: {}]   ;;  %s451_s2 = inlined_call_operand.vmem [shape: bf16[32,32], index: 2, kind: input, shape index: {}]   ;;  %s452_s0 = inlined_call_operand.vmem [shape: bf16[16,32], index: 0, kind: input, shape index: {}]   ;;  %s453_s3 = inlined_call_operand.vmem [shape: bf16[32,32], index: 3, kind: input, shape index: {}]   ;;  %s454_s4 = inlined_call_operand.vmem [shape: bf16[16,32], index: 4, kind: output, shape index: {0}]   ;;  %s455_s5 = inlined_call_operand.vmem [shape: bf16[16,32], index: 5, kind: output, shape index: {1}]   ;;  %s456_s6 = inlined_call_operand.vmem [shape: bf16[16,32], index: 6, kind: output, shape index: {2}]  }
   0x1   :  { %317 = vmatprep.subr.bf16.mxu0 %v350_v0  ;;  %v343_v1 = vld [vmem:[%s450_s1] sm:$0xff]   ;;  %325 = vmatprep.subr.bf16.mxu1 %v350_v0  ;;  %26 = vst.msk [vmem:[#allocation2] sm:$0xff] %vm25_vm0, %v350_v0  ;;  %27 = vst.msk [vmem:[#allocation2 + $0x8] sm:$0xff] %vm25_vm0, %v350_v0  ;;  %v344_v2 = vld [vmem:[%s450_s1 + $0x8] sm:$0xff]  }
   0x2   :  { %28 = vst.msk [vmem:[#allocation3] sm:$0xff] %vm25_vm0, %v350_v0  ;;  %29 = vst.msk [vmem:[#allocation3 + $0x8] sm:$0xff] %vm25_vm0, %v350_v0  ;;  %321 = vmatprep.mubr.msk.bf16.mxu0 %vm351_vm1, %v350_v0  ;;  %329 = vmatprep.mubr.msk.bf16.mxu1 %vm351_vm1, %v350_v0  ;;  %v345_v3 = vld [vmem:[%s451_s2] sm:$0xff]   ;;  %v348_v5 = vld [vmem:[%s451_s2 + $0x8] sm:$0xff]  }
   0x3   :  { %30 = vst.msk [vmem:[#allocation4] sm:$0xff] %vm25_vm0, %v350_v0  ;;  %31 = vst.msk [vmem:[#allocation4 + $0x8] sm:$0xff] %vm25_vm0, %v350_v0  ;;  %318 = vmatpush3.bf16.msra.mxu0 %v343_v1  ;;  %326 = vmatpush3.bf16.msra.mxu1 %v345_v3  ;;  %v346_v4 = vld [vmem:[%s452_s0] sm:$0xff]   ;;  %v349_v7 = vld [vmem:[%s453_s3 + $0x8] sm:$0xff]  }
   0x4   :  { %319 = vmatprep.subr.bf16.mxu0 %v350_v0  ;;  %327 = vmatprep.subr.bf16.mxu1 %v350_v0  ;;  %v347_v6 = vld [vmem:[%s453_s3] sm:$0xff]  }
   0x7   :  { %320 = vmatpush3.bf16.msra.mxu0 %v344_v2  ;;  %328 = vmatpush3.bf16.msra.mxu1 %v348_v5 }
   0x8   :  { %333 = vmatprep.subr.bf16.mxu0 %v350_v0  ;;  %v34_v8 = vld [vmem:[#allocation2] sm:$0xff]  ;;  %v35_v10 = vld [vmem:[#allocation2 + $0x8] sm:$0xff] }
   0x9   :  { %v106_v11 = vld [vmem:[#allocation3] sm:$0xff]  ;;  %v107_v16 = vld [vmem:[#allocation3 + $0x8] sm:$0xff] }
   0xa   :  { %322 = vmatmul.mubr.msk.bf16.vlgmr.msra.gmra.mrb[0].mxu0 %vm25_vm0, %v346_v4  ;;  %330 = vmatmul.mubr.msk.bf16.vlgmr.msra.gmra.mrb[0].mxu1 %vm25_vm0, %v346_v4  ;;  %v169_v24 = vld [vmem:[#allocation4] sm:$0xff]  ;;  %v170_v26 = vld [vmem:[#allocation4 + $0x8] sm:$0xff] }
   0xb   :  { %334 = vmatpush3.bf16.msra.mxu0 %v347_v6  ;;  %337 = vmatprep.mubr.msk.bf16.mxu0 %vm351_vm1, %v350_v0 }
   0xc   :  { %335 = vmatprep.subr.bf16.mxu0 %v350_v0 }
   0xf   :  { %336 = vmatpush3.bf16.msra.mxu0 %v349_v7 }
  0x12   :  { %338 = vmatmul.mubr.msk.bf16.vlgmr.msra.gmra.mrb[4].mxu0 %vm25_vm0, %v346_v4 }
  0xdd   :  { %v95_v9 = vpop.f32.mrb[0].mxu0  ;;  %v158_v15 = vpop.f32.mrb[0].mxu1 }
  0xde   :  { %v102_v12 = vadd.f32 %v95_v9, %v34_v8  ;;  %v323_v13 = vpop.f32.mrb[1].mxu0  ;;  %v165_v19 = vadd.f32 %v158_v15, %v106_v11  ;;  %v331_v20 = vpop.f32.mrb[1].mxu1 }
  0xdf   :  { %v98_v14 = vpop.f32.mrb[2].mxu0  ;;  %v161_v21 = vpop.f32.mrb[2].mxu1 }
  0xe0   :  { %104 = vst.msk [vmem:[#allocation2] sm:$0xff] %vm25_vm0, %v102_v12  ;;  %v103_v17 = vadd.f32 %v98_v14, %v35_v10  ;;  %v324_v18 = vpop.f32.mrb[3].mxu0  ;;  %167 = vst.msk [vmem:[#allocation3] sm:$0xff] %vm25_vm0, %v165_v19  ;;  %v166_v22 = vadd.f32 %v161_v21, %v107_v16  ;;  %v332_v23 = vpop.f32.mrb[3].mxu1 }
  0xe2   :  { %105 = vst.msk [vmem:[#allocation2 + $0x8] sm:$0xff] %vm25_vm0, %v103_v17  ;;  %168 = vst.msk [vmem:[#allocation3 + $0x8] sm:$0xff] %vm25_vm0, %v166_v22 }
  0xe5   :  { %v221_v25 = vpop.f32.mrb[4].mxu0 }
  0xe6   :  { %v228_v27 = vadd.f32 %v221_v25, %v169_v24  ;;  %v339_v28 = vpop.f32.mrb[5].mxu0 }
  0xe7   :  { %v235_v29 = vld [vmem:[#allocation2] sm:$0xff]  ;;  %v224_v30 = vpop.f32.mrb[6].mxu0  ;;  %v250_v35 = vld [vmem:[#allocation3] sm:$0xff] }
  0xe8   :  { %v237_v31 = vmul.f32 0.35355338, %v235_v29  ;;  %230 = vst.msk [vmem:[#allocation4] sm:$0xff] %vm25_vm0, %v228_v27  ;;  %v229_v32 = vadd.f32 %v224_v30, %v170_v26  ;;  %v340_v33 = vpop.f32.mrb[7].mxu0  ;;  %v304_v38 = vpack.c.bf16 %v250_v35, %v250_v35 }
  0xe9   :  { %v236_v34 = vld [vmem:[#allocation2 + $0x8] sm:$0xff]  ;;  %v251_v39 = vld [vmem:[#allocation3 + $0x8] sm:$0xff] }
  0xea   :  { %v302_v36 = vpack.c.bf16 %v237_v31, %v237_v31  ;;  %v238_v37 = vmul.f32 0.35355338, %v236_v34  ;;  %231 = vst.msk [vmem:[#allocation4 + $0x8] sm:$0xff] %vm25_vm0, %v229_v32  ;;  %v305_v41 = vpack.c.bf16 %v251_v39, %v251_v39 }
  0xeb   :  { %260 = vst.msk [vmem:[%s455_s5] sm:$0xf] %vm247_vm2, %v304_v38 }
  0xec   :  { %248 = vst.msk [vmem:[%s454_s4] sm:$0xf] %vm247_vm2, %v302_v36  ;;  %v303_v40 = vpack.c.bf16 %v238_v37, %v238_v37  ;;  %261 = vst.msk [vmem:[%s455_s5 + $0x4] sm:$0xf] %vm247_vm2, %v305_v41 }
  0xee   :  { %249 = vst.msk [vmem:[%s454_s4 + $0x4] sm:$0xf] %vm247_vm2, %v303_v40 }
  0xef   :  { %v262_v42 = vld [vmem:[#allocation4] sm:$0xff] }
  0xf0   :  { %v306_v43 = vpack.c.bf16 %v262_v42, %v262_v42 }
  0xf1   :  { %v263_v44 = vld [vmem:[#allocation4 + $0x8] sm:$0xff] }
  0xf2   :  { %272 = vst.msk [vmem:[%s456_s6] sm:$0xf] %vm247_vm2, %v306_v43  ;;  %v307_v45 = vpack.c.bf16 %v263_v44, %v263_v44 }
  0xf4   :  { %273 = vst.msk [vmem:[%s456_s6 + $0x4] sm:$0xf] %vm247_vm2, %v307_v45 }

// kernel: flash_attention_forward.4
= control target key start
LH: loop header
LB: loop body
LE: loop exit
PB: predicated region body
PF: predicated region fallthrough
CT: control target
= control target key end

     0   :  { %s772_s12 = smov 0   ;;  %s774_s13 = smov 0   ;;  %s846_s0 = inlined_call_operand.vmem [shape: bf16[2,4,8,8], index: 0, kind: input, shape index: {}]   ;;  %s847_s1 = inlined_call_operand.vmem [shape: bf16[2,4,8,8], index: 1, kind: input, shape index: {}]   ;;  %s848_s2 = inlined_call_operand.vmem [shape: bf16[2,4,8,8], index: 2, kind: input, shape index: {}]   ;;  %s849_s3 = inlined_call_operand.vmem [shape: bf16[2,4,8,8], index: 3, kind: output, shape index: {}]  }
   0x1   :  { %s776_s14 = smov 0   ;;  %s778_s15 = smov 0  }
   0x2   :  { %s780_s16 = smov 0  }
   0x3 LB: > { %s35_s17 = sadd.s32 1, %s738_s14  ;;  %s39_s18 = sadd.s32 1, %s742_s15  ;;  %s746_s16 = sphi %s780_s16, %s13_s16   ;;  %s742_s15 = sphi %s778_s15, %s853_s15   ;;  %s738_s14 = sphi %s776_s14, %s852_s14   ;;  %s734_s13 = sphi %s774_s13, %s851_s13   ;;  %s730_s12 = sphi %s772_s12, %s850_s12  }
   0x4   : > { %p37_p0 = scmp.ge.s32.totalorder %s35_s17, 4  ;;  %p627_p1 = scmp.ge.s32.totalorder %s746_s16, 1 }
   0x5   : > { %p217_p2 = scmp.lt.s32.totalorder %s746_s16, 9 }
   0x6   : > { %s855_s17 = smov (%p37_p0, %s35_s17), 0  ;;  %s857_s18 = smov (!%p37_p0, %s39_s18), %s742_s15 }
   0x7   : > { %p218_p3 = pnand %p627_p1, %p217_p2  ;;  %p41_p4 = scmp.ge.s32.totalorder %s857_s18, 2 }
   0x8   : > { %p275_p5 = scmp.lt.s32.totalorder (!%p218_p3), %s734_s13, 1  ;;  %p277_p6 = scmp.lt.s32.totalorder (!%p218_p3), %s730_s12, 3  ;;  %vm327_vm0 = vcmask (!%p218_p3), 64512   ;;  %v748_v0 = vmov (!%p218_p3), 0.0   ;;  %vm749_vm1 = vmmov (!%p218_p3), 0   ;;  %vm324_vm2 = vcmask (!%p218_p3), 7168  }
   0x9   : > { %s859_s18 = smov (%p41_p4, %s857_s18), 0  ;;  %221 = sbr.rel (%p218_p3) target bundleno = 827 (0x33b), region = 32 }
   0xa   : > { %644 = vmatprep.subr.bf16.mxu0 (!%p218_p3), %v748_v0  ;;  %328 = vst.msk [vmem:[#allocation4] sm:$0xff] (!%p218_p3), %vm327_vm0, %v748_v0  ;;  %646 = vmatprep.mubr.msk.bf16.mxu0 (!%p218_p3), %vm749_vm1, %v748_v0  ;;  %v750_v4 = vmov (!%p218_p3), -inf   ;;  %v751_v10 = vmov (!%p218_p3), 0   ;;  %vm414_vm3 = vcmask (!%p218_p3), 1043456   ;;  %vm474_vm4 = vcmask (!%p218_p3), 60416  }
   0xb   : > { %650 = vmatprep.subr.bf16.mxu1 (!%p218_p3), %v748_v0  ;;  %652 = vmatprep.mubr.msk.bf16.mxu1 (!%p218_p3), %vm749_vm1, %v748_v0  ;;  %325 = vst.msk [vmem:[#allocation2] sm:$0xff] (!%p218_p3), %vm324_vm2, %v750_v4  ;;  %326 = vst.msk [vmem:[#allocation3] sm:$0xff] (!%p218_p3), %vm324_vm2, %v748_v0 }
   0xc   : > { %700 = vset.pattern.permute.xlu0 (!%p218_p3), %v751_v10  ;;  %701 = vset.pattern.permute.xlu1 (!%p218_p3), %v751_v10 }
  0x10   : > { %s861_s13 = smov (!%p275_p5, %s734_s13), 1  ;;  %s863_s12 = smov (!%p277_p6, %s730_s12), 3 }
  0x11   : > { %s628_s19 = sshll.u32 %s861_s13, 2  ;;  %v403_v30 = vld [vmem:[#allocation4] sm:$0xff] }
  0x12   : > { %s283_s20 = sadd.s32 %s628_s19, %s863_s12  ;;  %v379_v11 = vld [vmem:[#allocation2] sm:$0xff]  ;;  %v395_v25 = vld [vmem:[#allocation3] sm:$0xff] }
  0x13   : > { %s803_s21 = sshll.u32 %s283_s20, 2 }
  0x14   : > { %s296_s24 = scalar_lea.vmem %s847_s1, %s803_s21  ;;  %s285_s27 = scalar_lea.vmem %s846_s0, %s803_s21 }
  0x15   : > { %v330_v1 = vld [vmem:[%s296_s24] sm:$0xf]  ;;  %s307_s30 = scalar_lea.vmem %s848_s2, %s803_s21  ;;  %s318_s6 = scalar_lea.vmem %s849_s3, %s803_s21 }
  0x16   : > { %v337_v2 = vsel %vm327_vm0, %v330_v1, 0  ;;  %v329_v3 = vld [vmem:[%s285_s27] sm:$0xf] }
  0x17   : > { %645 = vmatpush3.bf16.xpose.msra.mxu0 %v337_v2  ;;  %v331_v15 = vld [vmem:[%s307_s30] sm:$0xf] }
  0x18   : > { %v416_v16 = vsel %vm414_vm3, %v331_v15, 0 }
  0x19   : > { %651 = vmatpush3.bf16.msra.mxu1 %v416_v16 }
  0x1e   : > { %647 = vmatmul.mubr.msk.bf16.vlgmr.msra.gmra.mrb[0].mxu0 %vm327_vm0, %v329_v3 }
  0xf1   : > { %v373_v5 = vpop.f32.mrb[0].mxu0 }
  0xf2   : > { %v648_v6 = vpop.f32.mrb[1].mxu0  ;;  %v380_v7 = vsel %vm327_vm0, %v373_v5, -inf }
  0xf3   : > { %381 = vmax.xlane.f32.xlu0 %v380_v7  ;;  %v376_v8 = vpop.f32.mrb[2].mxu0 }
  0xf4   : > { %v649_v9 = vpop.f32.mrb[3].mxu0 }
 0x180   : > { %v382_v12 = vpop.xlane.xlu0 %381 }
 0x181   : > { %v383_v13 = vmax.f32 %v379_v11, %v382_v12 }
 0x183   : > { %v384_v14 = vsub.f32 %v379_v11, %v383_v13  ;;  %460 = vst.msk [vmem:[#allocation2] sm:$0xff] %vm324_vm2, %v383_v13  ;;  %389 = vperm.xlu0 %700, %v383_v13  }
 0x185   : > { %v385_v23 = vmul.f32 1.442695, %v384_v14 }
 0x202   : > { %v390_v17 = vpop.permute.xlu0 %389 }
 0x203   : > { %v392_v18 = vsub.f32 %v373_v5, %v390_v17 }
 0x205   : > { %v393_v19 = vmul.f32 1.442695, %v392_v18 }
 0x207   : > { %702 = vpow2.f32 %v393_v19 }
 0x208   : > { %704 = vpow2.f32 %v385_v23 }
 0x211   : > { %v703_v20 = vpop.eup %702 }
 0x212   : > { %v397_v21 = vsel %vm327_vm0, %v703_v20, 0.0  ;;  %v410_v22 = vpack.c.bf16 %v703_v20, %v703_v20  ;;  %v705_v24 = vpop.eup %704 }
 0x213   : > { %398 = vadd.xlane.f32.xlu1 %v397_v21  ;;  %v396_v26 = vmul.f32 %v705_v24, %v395_v25 }
 0x214   : > { %653 = vmatmul.mubr.msk.bf16.vlgmr.msra.gmra.mrb[0].mxu1 %vm327_vm0, %v410_v22 }
 0x224   : > { %406 = vperm.xlu1 %701, %v705_v24  }
 0x2a0   : > { %v399_v27 = vpop.xlane.xlu1 %398 }
 0x2a1   : > { %v400_v28 = vadd.f32 %v399_v27, %v396_v26 }
 0x2a3   : > { %402 = vst.msk [vmem:[#allocation3] sm:$0xff] %vm324_vm2, %v400_v28 }
 0x2a4   : > { %v407_v31 = vpop.permute.xlu1 %406 }
 0x2a5   : > { %v409_v32 = vmul.f32 %v407_v31, %v403_v30 }
 0x2aa   : > { %v465_v29 = vld [vmem:[#allocation3] sm:$0xff] }
 0x2ab   : > { %468 = vperm.xlu1 %701, %v465_v29  }
 0x2e7   : > { %v452_v33 = vpop.f32.mrb[0].mxu1 }
 0x2e8   : > { %v458_v34 = vadd.f32 %v452_v33, %v409_v32  ;;  %v654_v35 = vpop.f32.mrb[1].mxu1 }
 0x2e9   : > { %v455_v36 = vpop.f32.mrb[2].mxu1 }
 0x2ea   : > { %459 = vst.msk [vmem:[#allocation4] sm:$0xff] %vm327_vm0, %v458_v34  ;;  %v655_v37 = vpop.f32.mrb[3].mxu1 }
 0x2f1   : > { %v464_v40 = vld [vmem:[#allocation4] sm:$0xff] }
 0x32a   : > { %v469_v38 = vpop.permute.xlu1 %468 }
 0x32b   : > { %706 = vrcp.f32 %v469_v38 }
 0x335   : > { %v707_v39 = vpop.eup %706 }
 0x336   : > { %v472_v41 = vmul.f32 %v707_v39, %v464_v40 }
 0x338   : > { %v473_v42 = vpack.c.bf16 %v472_v41, %v472_v41 }
 0x33a   : > { %475 = vst.msk [vmem:[%s318_s6] sm:$0xf] %vm474_vm4, %v473_v42 }
 0x33b PF: > { %s13_s16 = sadd.s32 1, %s746_s16   ;;  %s850_s12 = smov %s738_s14 }
 0x33c   : > { %p10_p7 = scmp.ge.s32.totalorder %s13_s16, 10   ;;  %s851_s13 = smov %s742_s15 }
 0x33d   : > { %s852_s14 = smov %s855_s17  ;;  %s853_s15 = smov %s859_s18 }
 0x33e   :  { %12 = sbr.rel (!%p10_p7) target bundleno = 3 (0x3), region = 76 }

</bundles_post_ra>
